<compile_context>
chip_gen: v7x
topology: tpu7x:2x2x1
jax: 0.10.0
libtpu: 0.0.40
codegen_flags: <defaults>
</compile_context>

<pallas_src>
import functools
import math

import jax
import jax.numpy as jnp
from jax.experimental import pallas as pl
from jax.experimental.pallas import tpu as pltpu

EPS = 1e-5
_VMEM_LIMIT = 48 * 1024 * 1024  # safe on v5e/v6e (128 MiB) and v7x (64 MiB)


def _pick_tile(dim, cap, mult):
    """Largest tile <= cap that divides dim and is a multiple of `mult`.

    Falls back to the full dim (always a legal block) if no such divisor exists,
    so we never need wrapper-side padding."""
    if dim <= cap:
        return dim
    start = cap - cap % mult
    for t in range(start, 0, -mult):
        if dim % t == 0:
            return t
    return dim


# ----------------------------------------------------------------------------
# Tiled matmul (optionally fused ReLU epilogue) — used for QKV projection, fc1.
# ----------------------------------------------------------------------------
def _matmul_kernel(a_ref, b_ref, o_ref, acc_ref, *, relu):
    k = pl.program_id(2)

    @pl.when(k == 0)
    def _():
        acc_ref[...] = jnp.zeros_like(acc_ref)

    acc_ref[...] += jnp.dot(a_ref[...], b_ref[...],
                            preferred_element_type=jnp.float32)

    @pl.when(k == pl.num_programs(2) - 1)
    def _():
        y = acc_ref[...]
        if relu:
            y = jnp.maximum(y, 0.0)
        o_ref[...] = y.astype(o_ref.dtype)


def matmul(a, b, *, relu=False, tm_cap=256, tn_cap=256, tk_cap=512):
    M, K = a.shape
    K2, N = b.shape
    assert K == K2
    tm = min(tm_cap, M)                 # row tile: big, multiple of 8 (or full M)
    tn = _pick_tile(N, tn_cap, 128)     # lane-dense output tile
    tk = _pick_tile(K, tk_cap, 128)
    grid = (pl.cdiv(M, tm), N // tn, K // tk)
    return pl.pallas_call(
        functools.partial(_matmul_kernel, relu=relu),
        out_shape=jax.ShapeDtypeStruct((M, N), a.dtype),
        grid_spec=pltpu.PrefetchScalarGridSpec(
            num_scalar_prefetch=0,
            grid=grid,
            in_specs=[
                pl.BlockSpec((tm, tk), lambda i, j, k: (i, k)),
                pl.BlockSpec((tk, tn), lambda i, j, k: (k, j)),
            ],
            out_specs=pl.BlockSpec((tm, tn), lambda i, j, k: (i, j)),
            scratch_shapes=[pltpu.VMEM((tm, tn), jnp.float32)],
        ),
        compiler_params=pltpu.CompilerParams(
            dimension_semantics=("parallel", "parallel", "arbitrary"),
            vmem_limit_bytes=_VMEM_LIMIT,
        ),
    )(a, b)


# ----------------------------------------------------------------------------
# Fused matmul + residual add + LayerNorm(weight-only, eps=1e-5).
# Output block holds the FULL hidden dim per row, so the LN epilogue sees whole
# rows in VMEM and the normalized activations never round-trip HBM separately.
# ----------------------------------------------------------------------------
def _matmul_res_ln_kernel(a_ref, w_ref, r_ref, g_ref, o_ref, acc_ref):
    k = pl.program_id(1)

    @pl.when(k == 0)
    def _():
        acc_ref[...] = jnp.zeros_like(acc_ref)

    acc_ref[...] += jnp.dot(a_ref[...], w_ref[...],
                            preferred_element_type=jnp.float32)

    @pl.when(k == pl.num_programs(1) - 1)
    def _():
        y = acc_ref[...] + r_ref[...].astype(jnp.float32)
        # one-pass mean / variance (E[x^2] - E[x]^2), f32 accumulation
        mean = jnp.mean(y, axis=-1, keepdims=True)
        mean_sq = jnp.mean(y * y, axis=-1, keepdims=True)
        var = mean_sq - mean * mean
        inv = jax.lax.rsqrt(var + EPS)
        out = (y - mean) * inv * g_ref[...].astype(jnp.float32)
        o_ref[...] = out.astype(o_ref.dtype)  # lane-dense full-C store


def matmul_residual_layernorm(a, w, resid, ln_w, *, tm_cap=256, tk_cap=512):
    """Returns LayerNorm(resid + a @ w) * ln_w   (bias-free, eps=1e-5)."""
    M, K = a.shape
    K2, C = w.shape
    assert K == K2 and resid.shape == (M, C)
    assert C % 128 == 0, "hidden dim must be lane-dense (multiple of 128)"
    tm = min(tm_cap, M)
    tk = _pick_tile(K, tk_cap, 128)
    grid = (pl.cdiv(M, tm), K // tk)
    return pl.pallas_call(
        _matmul_res_ln_kernel,
        out_shape=jax.ShapeDtypeStruct((M, C), a.dtype),
        grid_spec=pltpu.PrefetchScalarGridSpec(
            num_scalar_prefetch=0,
            grid=grid,
            in_specs=[
                pl.BlockSpec((tm, tk), lambda i, k: (i, k)),   # activations
                pl.BlockSpec((tk, C), lambda i, k: (k, 0)),    # weight
                pl.BlockSpec((tm, C), lambda i, k: (i, 0)),    # residual (resident)
                pl.BlockSpec((1, C), lambda i, k: (0, 0)),     # LN gamma (resident)
            ],
            out_specs=pl.BlockSpec((tm, C), lambda i, k: (i, 0)),
            scratch_shapes=[pltpu.VMEM((tm, C), jnp.float32)],
        ),
        compiler_params=pltpu.CompilerParams(
            dimension_semantics=("parallel", "arbitrary"),
            vmem_limit_bytes=_VMEM_LIMIT,
        ),
    )(a, w, resid, ln_w.reshape(1, C))


# ----------------------------------------------------------------------------
# Multi-head attention core: per (batch, head) grid, full softmax (no mask),
# scale 1/sqrt(d_k), f32 accumulation.  Whole (T, d_k) tiles live in VMEM.
# TODO(synk): for long sequences, tile the KV axis flash-attention style
# (online softmax) instead of holding the full (T, T) score matrix.
# ----------------------------------------------------------------------------
def _attention_kernel(q_ref, k_ref, v_ref, o_ref, *, scale):
    q = q_ref[0, 0, :, :].astype(jnp.float32)   # (T, dk)
    k = k_ref[0, 0, :, :].astype(jnp.float32)   # (T, dk)
    v = v_ref[0, 0, :, :].astype(jnp.float32)   # (T, dk)
    # scores = q @ k^T  (contract the head dim of both -> NT matmul on the MXU)
    s = jax.lax.dot_general(q, k, (((1,), (1,)), ((), ())),
                            preferred_element_type=jnp.float32) * scale
    m = jnp.max(s, axis=-1, keepdims=True)
    p = jnp.exp(s - m)
    l = jnp.sum(p, axis=-1, keepdims=True)
    o = jnp.dot(p, v, preferred_element_type=jnp.float32) / l
    o_ref[0, 0, :, :] = o.astype(o_ref.dtype)


def attention(q, k, v):
    """q, k, v: (B, H, T, dk) -> (B, H, T, dk), softmax(q k^T / sqrt(dk)) v."""
    B, H, T, dk = q.shape
    blk = pl.BlockSpec((1, 1, T, dk), lambda b, h: (b, h, 0, 0))
    return pl.pallas_call(
        functools.partial(_attention_kernel, scale=1.0 / math.sqrt(dk)),
        out_shape=jax.ShapeDtypeStruct((B, H, T, dk), q.dtype),
        grid_spec=pltpu.PrefetchScalarGridSpec(
            num_scalar_prefetch=0,
            grid=(B, H),
            in_specs=[blk, blk, blk],
            out_specs=blk,
        ),
        compiler_params=pltpu.CompilerParams(
            dimension_semantics=("parallel", "parallel"),
            vmem_limit_bytes=_VMEM_LIMIT,
        ),
    )(q, k, v)


# ----------------------------------------------------------------------------
# TransformerBlock forward (matches the PyTorch module: post-norm, bias=False)
# ----------------------------------------------------------------------------
def transformer_block(x, params):
    B, T, C = x.shape
    H = params["n_head"]
    dk = C // H
    N = B * T
    assert C % 128 == 0, "n_embd must be a multiple of 128 for lane-dense tiles"

    x2d = x.reshape(N, C)

    # Fused QKV projection: read x once instead of three times.
    wqkv = jnp.concatenate([params["wq"], params["wk"], params["wv"]], axis=1)
    qkv = matmul(x2d, wqkv)                       # (N, 3C)
    q, k, v = jnp.split(qkv, 3, axis=-1)

    def to_heads(t):                              # (N, C) -> (B, H, T, dk)
        return t.reshape(B, T, H, dk).transpose(0, 2, 1, 3)

    o = attention(to_heads(q), to_heads(k), to_heads(v))        # (B, H, T, dk)
    o = o.transpose(0, 2, 1, 3).reshape(N, C)                   # concat heads

    # out-projection + residual + LN1, fused (no standalone LN HBM pass)
    h = matmul_residual_layernorm(o, params["wo"], x2d, params["ln1_w"])

    # MLP: fc1 with fused ReLU epilogue, then fc2 + residual + LN2 fused
    u = matmul(h, params["w1"], relu=True)                      # (N, 4C)
    y = matmul_residual_layernorm(u, params["w2"], h, params["ln2_w"])

    return y.reshape(B, T, C)


# ----------------------------------------------------------------------------
# Pure-JAX reference (mirrors the PyTorch module exactly)
# ----------------------------------------------------------------------------
def ref_transformer_block(x, p):
    B, T, C = x.shape
    H = p["n_head"]
    dk = C // H

    def heads(t):
        return t.reshape(B, T, H, dk).transpose(0, 2, 1, 3)

    q, k, v = heads(x @ p["wq"]), heads(x @ p["wk"]), heads(x @ p["wv"])
    s = jnp.einsum("bhtd,bhsd->bhts", q, k) / math.sqrt(dk)
    a = jax.nn.softmax(s, axis=-1)
    o = jnp.einsum("bhts,bhsd->bhtd", a, v)
    o = o.transpose(0, 2, 1, 3).reshape(B, T, C)
    attn_out = o @ p["wo"]

    def ln(t, w):
        m = jnp.mean(t, axis=-1, keepdims=True)
        var = jnp.mean((t - m) ** 2, axis=-1, keepdims=True)
        return (t - m) * jax.lax.rsqrt(var + EPS) * w

    h = ln(x + attn_out, p["ln1_w"])
    ff = jnp.maximum(h @ p["w1"], 0.0) @ p["w2"]
    return ln(h + ff, p["ln2_w"])


if __name__ == "__main__":
    # Small but lane-dense shapes (C multiple of 128 per the perf review).
    B, T, C, H = 2, 16, 128, 4
    std = 0.02

    key = jax.random.PRNGKey(0)
    kx, kq, kk, kv, ko, k1, k2 = jax.random.split(key, 7)
    params = dict(
        n_head=H,
        wq=jax.random.normal(kq, (C, C), jnp.float32) * std,
        wk=jax.random.normal(kk, (C, C), jnp.float32) * std,
        wv=jax.random.normal(kv, (C, C), jnp.float32) * std,
        wo=jax.random.normal(ko, (C, C), jnp.float32) * std,
        w1=jax.random.normal(k1, (C, 4 * C), jnp.float32) * std,
        w2=jax.random.normal(k2, (4 * C, C), jnp.float32) * std,
        ln1_w=jnp.ones((C,), jnp.float32),   # nn.Parameter(torch.ones(ndim))
        ln2_w=jnp.ones((C,), jnp.float32),
    )
    x = jax.random.normal(kx, (B, T, C), dtype=jnp.float32)

    y = transformer_block(x, params)
    y = jax.block_until_ready(y)

    ref = ref_transformer_block(x, params)
    max_err = float(jnp.max(jnp.abs(y - ref)))
    assert jnp.allclose(y, ref, atol=2e-2, rtol=2e-2), (
        f"mismatch vs reference: max abs err {max_err}")

    print("KERNEL_OK")
</pallas_src>

<mosaic_0001>
module attributes {stable_mosaic.version = 11 : i64} {
  func.func @_matmul_kernel(%arg0: i32, %arg1: i32, %arg2: i32, %arg3: memref<32x128xf32, #tpu.memory_space<vmem>>, %arg4: memref<128x128xf32, #tpu.memory_space<vmem>>, %arg5: memref<32x128xf32, #tpu.memory_space<vmem>>, %arg6: memref<32x128xf32, #tpu.memory_space<vmem>>) attributes {dimension_semantics = [#tpu.dimension_semantics<parallel>, #tpu.dimension_semantics<parallel>, #tpu.dimension_semantics<arbitrary>], iteration_bounds = array<i64: 1, 3, 1>, scalar_prefetch = 0 : i64, scratch_operands = 1 : i64, tpu.core_type = #tpu.core_type<tc>, window_params = [{transform_indices = @transform_0, window_bounds = array<i64: 32, 128>}, {transform_indices = @transform_1, window_bounds = array<i64: 128, 128>}, {transform_indices = @transform_2, window_bounds = array<i64: 32, 128>}]} {
    %c0_i32 = arith.constant 0 : i32
    %0 = arith.cmpi eq, %arg2, %c0_i32 : i32
    %1 = arith.extui %0 : i1 to i32
    %c0_i32_0 = arith.constant 0 : i32
    %2 = arith.cmpi ne, %1, %c0_i32_0 : i32
    scf.if %2 {
      %cst_10 = arith.constant 0.000000e+00 : f32
      %12 = vector.broadcast %cst_10 : f32 to vector<32x128xf32>
      %c0_11 = arith.constant 0 : index
      %c0_12 = arith.constant 0 : index
      %13 = vector.load %arg6[%c0_11, %c0_12] : memref<32x128xf32, #tpu.memory_space<vmem>>, vector<32x128xf32>
      tpu.vector_store %arg6[%c0_11, %c0_12], %12 {strides = array<i32>} : memref<32x128xf32, #tpu.memory_space<vmem>>, vector<32x128xf32>,
    } else {
    }
    %c0 = arith.constant 0 : index
    %c0_1 = arith.constant 0 : index
    %3 = vector.load %arg6[%c0, %c0_1] : memref<32x128xf32, #tpu.memory_space<vmem>>, vector<32x128xf32>
    %c0_2 = arith.constant 0 : index
    %c0_3 = arith.constant 0 : index
    %4 = vector.load %arg3[%c0_2, %c0_3] : memref<32x128xf32, #tpu.memory_space<vmem>>, vector<32x128xf32>
    %c0_4 = arith.constant 0 : index
    %c0_5 = arith.constant 0 : index
    %5 = vector.load %arg4[%c0_4, %c0_5] : memref<128x128xf32, #tpu.memory_space<vmem>>, vector<128x128xf32>
    %cst = arith.constant dense<0.000000e+00> : vector<32x128xf32>
    %6 = tpu.matmul %4, %5, %cst {dimension_numbers = #tpu.dot_dimension_numbers<[1], [0], [0], [1], [0, 0, 1, 1], [], []>} : vector<32x128xf32>, vector<128x128xf32>, vector<32x128xf32> -> vector<32x128xf32>
    %7 = arith.addf %3, %6 : vector<32x128xf32>
    %c0_6 = arith.constant 0 : index
    %c0_7 = arith.constant 0 : index
    %8 = vector.load %arg6[%c0_6, %c0_7] : memref<32x128xf32, #tpu.memory_space<vmem>>, vector<32x128xf32>
    tpu.vector_store %arg6[%c0_6, %c0_7], %7 {strides = array<i32>} : memref<32x128xf32, #tpu.memory_space<vmem>>, vector<32x128xf32>,
    %c0_i32_8 = arith.constant 0 : i32
    %9 = arith.cmpi eq, %arg2, %c0_i32_8 : i32
    %10 = arith.extui %9 : i1 to i32
    %c0_i32_9 = arith.constant 0 : i32
    %11 = arith.cmpi ne, %10, %c0_i32_9 : i32
    scf.if %11 {
      %c0_10 = arith.constant 0 : index
      %c0_11 = arith.constant 0 : index
      %12 = vector.load %arg6[%c0_10, %c0_11] : memref<32x128xf32, #tpu.memory_space<vmem>>, vector<32x128xf32>
      %c0_12 = arith.constant 0 : index
      %c0_13 = arith.constant 0 : index
      %13 = vector.load %arg5[%c0_12, %c0_13] : memref<32x128xf32, #tpu.memory_space<vmem>>, vector<32x128xf32>
      tpu.vector_store %arg5[%c0_12, %c0_13], %12 {strides = array<i32>} : memref<32x128xf32, #tpu.memory_space<vmem>>, vector<32x128xf32>,
    } else {
    }
    return
  }
  func.func @transform_0(%arg0: i32, %arg1: i32, %arg2: i32) -> (i32, i32) {
    %c0_i32 = arith.constant 0 : i32
    return %arg0, %arg2 : i32, i32
  }
  func.func @transform_1(%arg0: i32, %arg1: i32, %arg2: i32) -> (i32, i32) {
    %c0_i32 = arith.constant 0 : i32
    return %arg2, %arg1 : i32, i32
  }
  func.func @transform_2(%arg0: i32, %arg1: i32, %arg2: i32) -> (i32, i32) {
    %c0_i32 = arith.constant 0 : i32
    return %arg0, %arg1 : i32, i32
  }
}

</mosaic_0001>

<bundles_post_ra>
// kernel: tpu_custom_call.1
= control target key start
LH: loop header
LB: loop body
LE: loop exit
PB: predicated region body
PF: predicated region fallthrough
CT: control target
= control target key end

     0   :  { %7 = vsyncpa [#allocation4], 0  ;;  %s1077_s0 = inlined_call_operand.hbm [shape: f32[32,128], index: 0, kind: input, shape index: {}]   ;;  %s1078_s1 = inlined_call_operand.hbm [shape: f32[128,384], index: 1, kind: input, shape index: {}]   ;;  %s1079_s2 = inlined_call_operand.hbm [shape: f32[32,384], index: 2, kind: output, shape index: {}]  }
   0x1   :  { %8 = vsyncpa [#allocation7], 0 }
   0x2   :  { %10 = vsyncpa [#allocation7 + $0x1], 0 }
   0x3   :  { %11 = vsyncpa [#allocation5], 0 }
   0x4   :  { %13 = vsyncpa [#allocation5 + $0x1], 0  ;;  %s842_s9 = smov 0   ;;  %s844_s10 = smov 0  }
   0x5   :  { %s846_s11 = smov 0   ;;  %s848_s12 = smov 0  }
   0x6   :  { %s850_s13 = smov 0   ;;  %s852_s14 = smov 0  }
   0x7 LB: > { %s472_s15 = sadd.s32 4294967295, %s816_s14   ;;  %s473_s16 = sadd.s32 4294967294, %s816_s14   ;;  %s816_s14 = sphi %s852_s14, %s19_s14   ;;  %s812_s13 = sphi %s850_s13, %s1104_s13   ;;  %s808_s12 = sphi %s848_s12, %s1103_s12   ;;  %s804_s11 = sphi %s846_s11, %s1102_s11   ;;  %s800_s10 = sphi %s844_s10, %s1101_s10   ;;  %s796_s9 = sphi %s842_s9, %s1100_s9  }
   0x8   : > { %p82_p0 = scmp.ne.s32.totalorder %s804_s11, %s800_s10  ;;  %p83_p1 = scmp.eq.s32.totalorder %s816_s14, 0 }
   0x9   : > { %p88_p2 = scmp.ne.s32.totalorder %s800_s10, %s796_s9  ;;  %p879_p3 = scmp.eq.s32.totalorder %s472_s15, 0 }
   0xa   : > { %p883_p4 = por %p83_p1, %p82_p0  ;;  %p114_p5 = scmp.eq.s32.totalorder %s472_s15, 2 }
   0xb   : > { %s1086_s17 = scalar_select %p879_p3, 1, 0 }
   0xc   : > { %p889_p6 = por %p879_p3, %p88_p2  ;;  %p120_p7 = scmp.eq.s32.totalorder %s473_s16, 2 }
   0xd   : > { %p893_p8 = por %p114_p5, %p82_p0  ;;  %p474_p9 = scmp.ge.s32.totalorder %s816_s14, 1 }
   0xe   : > { %s1088_s19 = scalar_select %p889_p6, 1, 0 }
   0xf   : > { %s1089_s20 = scalar_select %p893_p8, 1, 0 }
  0x10   : > { %p898_p10 = por %p120_p7, %p88_p2  ;;  %p127_p11 = scmp.lt.s32.totalorder %s816_s14, 4 }
  0x11   : > { %s818_s23 = smov [#allocation3]   ;;  %p614_p0 = scmp.lt.s32.totalorder %s816_s14, 3 }
  0x12   : > { %s1090_s21 = scalar_select %p898_p10, 1, 0 }
  0x13   : > { %p903_p12 = pnand %p474_p9, %p127_p11  ;;  %s143_s24 = sshll.u32 %s818_s23, 4  ;;  %s144_s24 = int_to_ptr.vmem [resolvable:$true] %s143_s24 }
  0x14   : > { %p918_p2 = pnand %p614_p0, %p883_p4  ;;  %s34_s27 = sadd.s32 1, %s812_s13 }
  0x15   : > { %s1091_s22 = scalar_select %p903_p12, 1, 0 }
  0x16   : > { %p601_p13 = pneg %p903_p12  ;;  %s672_s30 = scalar_lea.hbm %s1077_s0, 512 }
  0x17   : > { %s1093_s26 = scalar_select %p918_p2, 1, 0 }
  0x18   : > { %p912_p1 = pnand %p601_p13, %p879_p3  ;;  %p673_p5 = scmp.ne.s32.totalorder %s1077_s0, %s672_s30 }
  0x19   : > { %p679_p4 = scmp.lt.u32.totalorder %s672_s30, %s1077_s0 }
  0x1a   : > { %p674_p7 = pneg %p912_p1 }
  0x1c   : > { %p675_p9 = pnand %p674_p7, %p673_p5 }
  0x1e   : > { %p676_p11 = pneg %p675_p9 }
  0x20   : > { %p681_p13 = pnand %p679_p4, %p676_p11 }
  0x22   : > { %684 = shalt.err (!%p681_p13)
}
  0x23   : > { %s685_s7 = scalar_lea.vmem %s144_s24, 512  ;;  %p693_p6 = scmp.lt.s32.totalorder %s144_s24, %s144_s24 }
  0x24   : > { %p686_p0 = scmp.ne.s32.totalorder %s144_s24, %s685_s7  ;;  %p694_p3 = scmp.lt.s32.totalorder %s685_s7, %s685_s7 }
  0x26   : > { %p688_p10 = pnand %p686_p0, %p674_p7  ;;  %p695_p12 = por %p694_p3, %p693_p6 }
  0x28   : > { %p689_p8 = pneg %p688_p10 }
  0x2a   : > { %p696_p2 = pnand %p695_p12, %p689_p8 }
  0x2c   : > { %699 = shalt.err (!%p696_p2)
}
  0x2d   : > { %s819_s8 = smov 128   ;;  %s820_s15 = smov 8  }
  0x2e   : > { %604 = dma.hbm_to_vmem [thread:$0]  (!%p912_p1), %s1077_s0, 512, %s144_s24, [#allocation4], %s819_s8, %s819_s8, %s820_s15  }
  0x2f   : > { %p36_p10 = scmp.ge.s32.totalorder %s34_s27, 3  ;;  %s75_s23 = sadd.s32 1, %s804_s11 }
  0x30   : > { %s157_s28 = sand.u32 1, %s804_s11   ;;  %s478_s3 = sshll.u32 %s812_s13, 7 }
  0x31   : > { %s1106_s27 = smov (%p36_p10, %s34_s27), 0  ;;  %s477_s29 = sshll.u32 %s157_s28, 7 }
  0x32   : > { %s71_s30 = ssub.s32 %s812_s13, %s1106_s27  ;;  %s952_s5 = scalar_lea.hbm %s1078_s1, %s478_s3 }
  0x33   : > { %p73_p3 = scmp.eq.s32.totalorder %s71_s30, 0  ;;  %s161_s24 = scalar_lea.vmem [#allocation6], %s477_s29 }
  0x34   : > { %s170_s6 = sshll.u32 %s161_s24, 4  ;;  %s959_s16 = scalar_lea.sflag [#allocation7], %s157_s28  ;;  %s957_s6 = int_to_ptr.vmem [resolvable:$true] %s170_s6 }
  0x35   : > { %s955_s7 = scalar_select %p73_p3, %s804_s11, %s75_s23  }
  0x36   : > { %s700_s18 = scalar_lea.hbm %s952_s5, 2048  ;;  %p1094_p8 = scmp.ne.s32.totalorder %s1093_s26, 0 }
  0x37   : > { %p701_p6 = scmp.ne.s32.totalorder %s952_s5, %s700_s18  ;;  %s705_s25 = scalar_lea.hbm %s1078_s1, 6144 }
  0x38   : > { %p702_p12 = pneg %p1094_p8  ;;  %p706_p5 = scmp.lt.u32.totalorder %s952_s5, %s1078_s1 }
  0x39   : > { %p707_p7 = scmp.lt.u32.totalorder %s705_s25, %s700_s18  ;;  %p709_p11 = scmp.lt.u32.totalorder %s700_s18, %s952_s5 }
  0x3a   : > { %p703_p1 = pnand %p702_p12, %p701_p6 }
  0x3b   : > { %p708_p9 = por %p707_p7, %p706_p5 }
  0x3c   : > { %p704_p2 = pneg %p703_p1 }
  0x3d   : > { %p710_p4 = por %p709_p11, %p708_p9 }
  0x3f   : > { %p711_p13 = pnand %p710_p4, %p704_p2 }
  0x41   : > { %714 = shalt.err (!%p711_p13)
}
  0x42   : > { %s715_s23 = scalar_lea.vmem %s957_s6, 2048  ;;  %s821_s28 = smov [#allocation6]  }
  0x43   : > { %p716_p0 = scmp.ne.s32.totalorder %s957_s6, %s715_s23  ;;  %s720_s24 = sshll.u32 %s821_s28, 4  ;;  %s721_s24 = int_to_ptr.vmem [resolvable:$false] %s720_s24 }
  0x44   : > { %s722_s30 = scalar_lea.vmem %s721_s24, 4096  ;;  %p723_p6 = scmp.lt.s32.totalorder %s957_s6, %s721_s24 }
  0x45   : > { %p718_p10 = pnand %p716_p0, %p702_p12  ;;  %p724_p1 = scmp.lt.s32.totalorder %s722_s30, %s715_s23 }
  0x47   : > { %p719_p3 = pneg %p718_p10  ;;  %p725_p5 = por %p724_p1, %p723_p6 }
  0x49   : > { %p726_p7 = pnand %p725_p5, %p719_p3 }
  0x4b   : > { %729 = shalt.err (!%p726_p7)
}
  0x4c   : > { %s822_s18 = smov 384   ;;  %p1095_p12 = scmp.ne.s32.totalorder %s1091_s22, 0 }
  0x4d   : > { %608 = dma.hbm_to_vmem [thread:$0]  (!%p1094_p8), %s952_s5, 2048, %s957_s6, %s959_s16, %s822_s18, %s819_s8, %s820_s15  }
  0x4e   : > { %182 = sbr.rel (%p1095_p12) target bundleno = 354 (0x162), region = 28  ;;  %p1096_p2 = scmp.ne.s32.totalorder (!%p1095_p12), %s1086_s17, 0 }
  0x55   : > { %783 = dma.done.wait (%p1096_p2), [#allocation4], 512  }
  0x56   : > { %785 = vsyncadd (%p1096_p2), [#allocation4], 4294966784  ;;  %s996_s3 = sand.u32 1, %s800_s10   ;;  %p1097_p8 = scmp.ne.s32.totalorder %s1088_s19, 0 }
  0x57   : > { %s481_s26 = sshll.u32 %s996_s3, 7  ;;  %s189_s25 = scalar_lea.sflag [#allocation7], %s996_s3 }
  0x58   : > { %s1000_s29 = scalar_lea.vmem [#allocation6], %s481_s26 }
  0x59   : > { %787 = dma.done.wait (%p1097_p8), %s189_s25, 2048  }
  0x5a   : > { %789 = vsyncadd (%p1097_p8), %s189_s25, 4294965248  ;;  %v232_v0 = vld [vmem:[%s1000_s29] sm:$0xff]  ;;  %v233_v1 = vld [vmem:[%s1000_s29 + $0x8] sm:$0xff]  ;;  %s482_s17 = sshll.u32 %s996_s3, 5  ;;  %s484_s8 = sshll.u32 %s808_s12, 7 }
  0x5b   : > { %v234_v2 = vld [vmem:[%s1000_s29 + $0x10] sm:$0xff]  ;;  %v545_v3 = vpack.c.bf16 %v233_v1, %v232_v0  ;;  %v235_v4 = vld [vmem:[%s1000_s29 + $0x18] sm:$0xff]  ;;  %v236_v6 = vld [vmem:[%s1000_s29 + $0x20] sm:$0xff]  ;;  %s212_s19 = scalar_lea.vmem [#allocation8], %s482_s17  ;;  %s1029_s6 = scalar_lea.hbm %s1079_s2, %s484_s8 }
  0x5c   : > { %v549_v5 = vpack.c.bf16 %v235_v4, %v234_v2  ;;  %v237_v7 = vld [vmem:[%s1000_s29 + $0x28] sm:$0xff]  ;;  %v228_v9 = vld [vmem:[#allocation3] sm:$0xff]  ;;  %v230_v10 = vld [vmem:[#allocation3 + $0x10] sm:$0xff]  ;;  %s368_s22 = sshll.u32 %s212_s19, 4  ;;  %s353_s16 = scalar_lea.sflag [#allocation5], %s996_s3  ;;  %s1024_s22 = int_to_ptr.vmem [resolvable:$true] %s368_s22 }
  0x5d   : > { %546 = vmatprep.subr.bf16.mxu0 %v545_v3  ;;  %577 = vmatprep.subr.bf16.mxu1 %v545_v3  ;;  %v553_v8 = vpack.c.bf16 %v237_v7, %v236_v6  ;;  %v238_v11 = vld [vmem:[%s1000_s29 + $0x30] sm:$0xff]  ;;  %v239_v12 = vld [vmem:[%s1000_s29 + $0x38] sm:$0xff]  ;;  %v240_v14 = vld [vmem:[%s1000_s29 + $0x40] sm:$0xff]  ;;  %s730_s12 = scalar_lea.vmem %s1024_s22, 512  ;;  %p1098_p11 = scmp.ne.s32.totalorder %s1089_s20, 0 }
  0x5e   : > { %548 = vmatpush3.bf16.msra.mxu0 %v545_v3  ;;  %585 = vmatpush3.bf16.msra.mxu1 %v545_v3  ;;  %v557_v13 = vpack.c.bf16 %v239_v12, %v238_v11  ;;  %v241_v15 = vld [vmem:[%s1000_s29 + $0x48] sm:$0xff]  ;;  %v242_v17 = vld [vmem:[%s1000_s29 + $0x50] sm:$0xff]  ;;  %v243_v18 = vld [vmem:[%s1000_s29 + $0x58] sm:$0xff]  ;;  %p731_p9 = scmp.ne.s32.totalorder %s1024_s22, %s730_s12  ;;  %s823_s4 = smov [#allocation8]  }
  0x5f   : > { %550 = vmatprep.subr.bf16.mxu0 %v549_v5  ;;  %578 = vmatprep.subr.bf16.mxu1 %v549_v5  ;;  %v561_v16 = vpack.c.bf16 %v241_v15, %v240_v14  ;;  %v565_v19 = vpack.c.bf16 %v243_v18, %v242_v17  ;;  %v244_v20 = vld [vmem:[%s1000_s29 + $0x60] sm:$0xff]  ;;  %v245_v21 = vld [vmem:[%s1000_s29 + $0x68] sm:$0xff]  ;;  %v246_v23 = vld [vmem:[%s1000_s29 + $0x70] sm:$0xff]  ;;  %s734_s23 = sshll.u32 %s823_s4, 4  ;;  %s735_s23 = int_to_ptr.vmem [resolvable:$false] %s734_s23 }
  0x60   : > { %539 = vmatprep.mubr.f32.mxu0 %v228_v9  ;;  %542 = vmatprep.mubr.f32.mxu1 %v230_v10  ;;  %v569_v22 = vpack.c.bf16 %v245_v21, %v244_v20  ;;  %v247_v24 = vld [vmem:[%s1000_s29 + $0x78] sm:$0xff]  ;;  %v229_v26 = vld [vmem:[#allocation3 + $0x8] sm:$0xff]  ;;  %p732_p4 = pnand %p731_p9, %p1098_p11  ;;  %s736_s28 = scalar_lea.vmem %s735_s23, 1024 }
  0x61   : > { %v573_v25 = vpack.c.bf16 %v247_v24, %v246_v23  ;;  %v231_v27 = vld [vmem:[#allocation3 + $0x18] sm:$0xff]  ;;  %p737_p0 = scmp.lt.s32.totalorder %s1024_s22, %s735_s23  ;;  %p738_p10 = scmp.lt.s32.totalorder %s736_s28, %s730_s12 }
  0x62   : > { %552 = vmatpush3.bf16.msra.mxu0 %v549_v5  ;;  %586 = vmatpush3.bf16.msra.mxu1 %v549_v5  ;;  %p733_p13 = pneg %p732_p4 }
  0x63   : > { %554 = vmatprep.subr.bf16.mxu0 %v553_v8  ;;  %579 = vmatprep.subr.bf16.mxu1 %v553_v8  ;;  %p739_p3 = por %p738_p10, %p737_p0 }
  0x65   : > { %p740_p6 = pnand %p739_p3, %p733_p13 }
  0x66   : > { %556 = vmatpush3.bf16.msra.mxu0 %v553_v8  ;;  %587 = vmatpush3.bf16.msra.mxu1 %v553_v8 }
  0x67   : > { %558 = vmatprep.subr.bf16.mxu0 %v557_v13  ;;  %580 = vmatprep.subr.bf16.mxu1 %v557_v13 }
  0x6a   : > { %560 = vmatpush3.bf16.msra.mxu0 %v557_v13  ;;  %588 = vmatpush3.bf16.msra.mxu1 %v557_v13 }
  0x6b   : > { %562 = vmatprep.subr.bf16.mxu0 %v561_v16  ;;  %581 = vmatprep.subr.bf16.mxu1 %v561_v16 }
  0x6e   : > { %564 = vmatpush3.bf16.msra.mxu0 %v561_v16  ;;  %589 = vmatpush3.bf16.msra.mxu1 %v561_v16 }
  0x6f   : > { %566 = vmatprep.subr.bf16.mxu0 %v565_v19  ;;  %582 = vmatprep.subr.bf16.mxu1 %v565_v19 }
  0x72   : > { %568 = vmatpush3.bf16.msra.mxu0 %v565_v19  ;;  %590 = vmatpush3.bf16.msra.mxu1 %v565_v19 }
  0x73   : > { %570 = vmatprep.subr.bf16.mxu0 %v569_v22  ;;  %583 = vmatprep.subr.bf16.mxu1 %v569_v22 }
  0x76   : > { %572 = vmatpush3.bf16.msra.mxu0 %v569_v22  ;;  %591 = vmatpush3.bf16.msra.mxu1 %v569_v22 }
  0x77   : > { %574 = vmatprep.subr.bf16.mxu0 %v573_v25  ;;  %584 = vmatprep.subr.bf16.mxu1 %v573_v25 }
  0x7a   : > { %576 = vmatpush3.bf16.msra.mxu0 %v573_v25  ;;  %592 = vmatpush3.bf16.msra.mxu1 %v573_v25 }
  0x7d   : > { %540 = vmatmul.mubr.f32.vlgmr.msra.gmra.mrb[0].mxu0 %v229_v26  ;;  %543 = vmatmul.mubr.f32.vlgmr.msra.gmra.mrb[0].mxu1 %v231_v27 }
 0x150   : > { %v541_v28 = vpop.f32.mrb[0].mxu0  ;;  %v544_v29 = vpop.f32.mrb[0].mxu1 }
 0x151   : > { %349 = vst [vmem:[%s212_s19 + $0x8] sm:$0xff] %v541_v28  ;;  %351 = vst [vmem:[%s212_s19 + $0x18] sm:$0xff] %v544_v29  ;;  %v314_v30 = vpop.f32.mrb[1].mxu0  ;;  %v324_v31 = vpop.f32.mrb[1].mxu1 }
 0x152   : > { %348 = vst [vmem:[%s212_s19] sm:$0xff] %v314_v30  ;;  %350 = vst [vmem:[%s212_s19 + $0x10] sm:$0xff] %v324_v31 }
 0x153   : > { %743 = shalt.err (!%p740_p6)
}
 0x154   : > { %s744_s24 = scalar_lea.hbm %s1029_s6, 512  ;;  %s748_s26 = scalar_lea.hbm %s1079_s2, 1536 }
 0x155   : > { %p745_p1 = scmp.ne.s32.totalorder %s1029_s6, %s744_s24  ;;  %p749_p12 = scmp.lt.u32.totalorder %s1029_s6, %s1079_s2 }
 0x156   : > { %p750_p2 = scmp.lt.u32.totalorder %s748_s26, %s744_s24  ;;  %p752_p9 = scmp.lt.u32.totalorder %s744_s24, %s1029_s6 }
 0x157   : > { %p746_p5 = pnand %p745_p1, %p1098_p11 }
 0x158   : > { %p751_p8 = por %p750_p2, %p749_p12 }
 0x159   : > { %p747_p7 = pneg %p746_p5 }
 0x15a   : > { %p753_p4 = por %p752_p9, %p751_p8 }
 0x15c   : > { %p754_p13 = pnand %p753_p4, %p747_p7 }
 0x15e   : > { %757 = shalt.err (!%p754_p13)
}
 0x15f   : > { %s824_s17 = smov 128   ;;  %s825_s19 = smov 384  }
 0x160   : > { %s826_s8 = smov 8  }
 0x161   : > { %599 = dma.vmem_to_hbm [thread:$0]  (%p1098_p11), %s1024_s22, 512, %s1029_s6, %s353_s16, %s824_s17, %s825_s19, %s826_s8  }
 0x162 PF: > { %p616_p0 = scmp.ge.s32.totalorder %s816_s14, 2  ;;  %s383_s15 = sand.u32 1, %s796_s9  }
 0x163   : > { %p1099_p10 = scmp.ne.s32.totalorder %s1090_s21, 0  ;;  %s384_s5 = scalar_lea.sflag [#allocation5], %s383_s15 }
 0x165   : > { %p610_p3 = pnand %p616_p0, %p1099_p10 }
 0x167   : > { %791 = dma.done.wait (!%p610_p3), %s384_s5, 512  }
 0x168   : > { %793 = vsyncadd (!%p610_p3), %s384_s5, 4294966784  ;;  %s19_s14 = sadd.s32 1, %s816_s14   ;;  %s1100_s9 = smov %s800_s10 }
 0x169   : > { %p16_p6 = scmp.ge.s32.totalorder %s19_s14, 5   ;;  %s1101_s10 = smov %s804_s11 }
 0x16a   : > { %s1102_s11 = smov %s955_s7  ;;  %s1103_s12 = smov %s812_s13 }
 0x16b   : > { %s1104_s13 = smov %s1106_s27  ;;  %18 = sbr.rel (!%p16_p6) target bundleno = 7 (0x7), region = 87 }
 0x172   :  { %389 = vsyncpa [#allocation4], 1 }
 0x173   :  { %391 = vsyncpa [#allocation4 + $0x1], 1 }
 0x174   :  { %392 = vsyncpa [#allocation7], 1 }
 0x175   :  { %394 = vsyncpa [#allocation7 + $0x1], 1 }
 0x176   :  { %395 = vsyncpa [#allocation5], 1 }
 0x177   :  { %397 = vsyncpa [#allocation5 + $0x1], 1 }

</bundles_post_ra>
